<compile_context>
chip_gen: v6e
topology: v6e:2x2x1
jax: 0.10.0
libtpu: 0.0.40
codegen_flags: <defaults>
</compile_context>

<pallas_src>
import math

import jax
import jax.numpy as jnp
from jax.experimental import pallas as pl
from jax.experimental.pallas import tpu as pltpu

_LANES = 128
_SUBLANES = 8

# Per-step VMEM bytes for ONE set of streaming buffers (z-in + out + lane-padded
# f32 time-diffs).  Pallas double-buffers each stream, so the total streaming
# footprint is ~2x this (+ tiny resident w/b), i.e. ~28 MiB: comfortably inside
# v7x's 64 MiB physical VMEM and trivially inside v5e/v6e's 128 MiB.
_STREAM_SET_BUDGET_BYTES = 14 * 1024 * 1024
# Above the default scoped limits (16/32 MiB) but with headroom below v7x's
# 64 MiB physical VMEM for compiler scratch.
_VMEM_LIMIT_BYTES = 48 * 1024 * 1024
# Use exact-f32 VPU multiply-adds for the packed path when <= this many nodes
# share a 128-lane row; larger packing factors fall back to an MXU dot.
_MAX_VPU_GROUPS = 8


def _time_embedding_kernel_bcast(z_ref, t_ref, w_ref, b_ref, o_ref):
    # C is a multiple of 128 (or the odd-C fallback):
    #   scale[r, c] = t[r] * W[c] + (1 + bias[c])        (b_ref has the +1 folded in)
    scale = t_ref[...] * w_ref[...] + b_ref[...]
    o_ref[...] = (z_ref[...].astype(jnp.float32) * scale).astype(o_ref.dtype)


def _time_embedding_kernel_grouped(z_ref, t_ref, ew_ref, b_ref, o_ref):
    # Lane-dense packing: each 128-lane row holds G nodes x C channels.
    #   t_ref : (TILE_R, G)   per-row, per-group time diffs
    #   ew_ref: (G, 128)      ew[g, l] = W[l % C] if (l // C) == g else 0
    #   b_ref : (1, 128)      (1 + bias) tiled G times along lanes
    # scale[r, l] = t[r, l // C] * W[l % C] + (1 + bias[l % C])
    t = t_ref[...]
    ew = ew_ref[...]
    G = t.shape[1]
    if G <= _MAX_VPU_GROUPS:
        # Bit-exact f32 on the VPU; G broadcast multiply-adds, free under DMA slack.
        scale = b_ref[...] + t[:, 0:1] * ew[0:1, :]
        for g in range(1, G):
            scale = scale + t[:, g : g + 1] * ew[g : g + 1, :]
    else:
        # Very small C (G > 8): a tiny MXU matmul is cheaper than G VPU passes.
        scale = jnp.dot(t, ew, preferred_element_type=jnp.float32) + b_ref[...]
    o_ref[...] = (z_ref[...].astype(jnp.float32) * scale).astype(o_ref.dtype)


def _choose_tile_rows(R, CL, in_itemsize, out_itemsize):
    """Byte-budgeted row tile (sublane aligned) for the packed (R, CL) view."""
    # The (TILE_R, <=128) f32 time-diffs block is lane-padded to 128 lanes in
    # VMEM under (8,128) tiling -> account for it explicitly.
    per_row = CL * in_itemsize + CL * out_itemsize + _LANES * 4
    tile = _STREAM_SET_BUDGET_BYTES // per_row
    tile = max(_SUBLANES, (tile // _SUBLANES) * _SUBLANES)
    # Never larger than the (sublane-rounded-up) number of packed rows.
    tile = min(tile, -(-R // _SUBLANES) * _SUBLANES)
    return tile


def time_embedding_forward(z, time_diffs, weight, bias, *, max_tile_rows=None):
    """z: (N, C), time_diffs: (N,), weight: (C, 1) (PyTorch Linear layout), bias: (C,).

    out[n, c] = z[n, c] * (1 + time_diffs[n] * weight[c, 0] + bias[c])
    """
    N, C = z.shape
    out_dtype = z.dtype

    t = time_diffs.astype(jnp.float32).reshape(N)          # matches .float() in torch
    w = weight.astype(jnp.float32).reshape(C)
    b1 = (1.0 + bias.astype(jnp.float32)).reshape(C)       # fold the "+1" into the bias

    # --- lane-dense packing choice ---------------------------------------
    if C % _LANES == 0:
        G = 1                               # already lane dense
    elif _LANES % C == 0:
        G = _LANES // C                     # pack G nodes per 128-lane row
    else:
        G = 1  # TODO(synk): odd C (neither multiple nor divisor of 128) falls
               # back to masked (partial-lane) stores; correct but slower.
    CL = G * C

    # --- pad ONLY when the packed view needs it (at most G-1 rows) --------
    if N % G != 0:
        pad = G - N % G
        z_in = jnp.pad(z, ((0, pad), (0, 0)))
        t_in = jnp.pad(t, (0, pad))
        N_p = N + pad
    else:
        z_in, t_in, N_p = z, t, N
    R = N_p // G

    z_v = z_in.reshape(R, CL)               # row-major merge: free bitcast reshape

    # --- byte-budgeted row tile; pl.cdiv grid handles the partial last block
    TILE_R = _choose_tile_rows(R, CL, jnp.dtype(z.dtype).itemsize,
                               jnp.dtype(out_dtype).itemsize)
    if max_tile_rows is not None:
        TILE_R = min(TILE_R, max(_SUBLANES, (max_tile_rows // _SUBLANES) * _SUBLANES))
    grid = (pl.cdiv(R, TILE_R),)

    zo_spec = pl.BlockSpec((TILE_R, CL), lambda i: (i, 0))
    b_l = jnp.tile(b1, G).reshape(1, CL)
    b_spec = pl.BlockSpec((1, CL), lambda i: (0, 0))

    if G == 1:
        kernel = _time_embedding_kernel_bcast
        t_arr = t_in.reshape(R, 1)
        t_spec = pl.BlockSpec((TILE_R, 1), lambda i: (i, 0))
        w_arr = w.reshape(1, CL)
        w_spec = pl.BlockSpec((1, CL), lambda i: (0, 0))
    else:
        kernel = _time_embedding_kernel_grouped
        t_arr = t_in.reshape(R, G)
        t_spec = pl.BlockSpec((TILE_R, G), lambda i: (i, 0))
        lane = jnp.arange(CL)
        # ew[g, l] = W[l % C] * (l // C == g)
        w_arr = jnp.where((lane[None, :] // C) == jnp.arange(G)[:, None],
                          jnp.tile(w, G)[None, :], 0.0).astype(jnp.float32)
        w_spec = pl.BlockSpec((G, CL), lambda i: (0, 0))

    out = pl.pallas_call(
        kernel,
        out_shape=jax.ShapeDtypeStruct((R, CL), out_dtype),
        grid_spec=pltpu.PrefetchScalarGridSpec(
            num_scalar_prefetch=0,
            grid=grid,
            in_specs=[
                zo_spec,   # z tile, streams
                t_spec,    # time diffs, streams (lane-padded in VMEM; budgeted)
                w_spec,    # weight / expanded weight, resident
                b_spec,    # (1 + bias), resident
            ],
            out_specs=zo_spec,
        ),
        compiler_params=pltpu.CompilerParams(
            # TODO(synk): on v7x, confirm in a profile that this axis is sharded
            # across both TensorCores; if not, switch to pltpu.CORE_PARALLEL.
            dimension_semantics=("parallel",),
            vmem_limit_bytes=_VMEM_LIMIT_BYTES,
        ),
    )(z_v, t_arr, w_arr, b_l)

    out = out.reshape(N_p, C)
    return out if N_p == N else out[:N]


def _reference(z, time_diffs, weight, bias):
    C = z.shape[1]
    scale = (1.0 + time_diffs.astype(jnp.float32)[:, None] * weight.reshape(1, C)
             + bias[None, :])
    return (z.astype(jnp.float32) * scale).astype(z.dtype)


if __name__ == "__main__":
    key = jax.random.PRNGKey(0)

    def run_case(N, C, dtype=jnp.float32, max_tile_rows=None, atol=1e-5, rtol=1e-5):
        k_z, k_t, k_w, k_b = jax.random.split(jax.random.fold_in(key, N * 1000 + C), 4)
        stdv = 1.0 / math.sqrt(1.0)   # NormalLinear init, in_features = 1
        weight = stdv * jax.random.normal(k_w, (C, 1), dtype=jnp.float32)
        bias = stdv * jax.random.normal(k_b, (C,), dtype=jnp.float32)
        z = jax.random.normal(k_z, (N, C), dtype=jnp.float32).astype(dtype)
        time_diffs = jax.random.normal(k_t, (N,), dtype=jnp.float32)

        out = jax.block_until_ready(
            time_embedding_forward(z, time_diffs, weight, bias,
                                   max_tile_rows=max_tile_rows))
        ref = _reference(z, time_diffs, weight, bias)
        assert out.shape == (N, C), (out.shape, N, C)
        assert out.dtype == jnp.dtype(dtype), (out.dtype, dtype)
        assert jnp.allclose(out.astype(jnp.float32), ref.astype(jnp.float32),
                            atol=atol, rtol=rtol), (N, C, dtype)

    run_case(N=16, C=32)                        # packed VPU path (G=4), no padding
    run_case(N=10, C=32)                        # packed path with G-remainder pad + slice
    run_case(N=24, C=128)                       # lane-dense broadcast path (G=1)
    run_case(N=300, C=128, max_tile_rows=64)    # multi-step grid + partial last row block
    run_case(N=64, C=8)                         # packed MXU-dot path (G=16)
    run_case(N=20, C=48)                        # odd-C fallback (masked lane stores)
    run_case(N=32, C=128, dtype=jnp.bfloat16, atol=2e-2, rtol=2e-2)  # bf16 end-to-end

    print("KERNEL_OK")
</pallas_src>

<mosaic_0001>
module attributes {stable_mosaic.version = 11 : i64} {
  func.func @_time_embedding_kernel_grouped(%arg0: i32, %arg1: memref<8x128xf32, #tpu.memory_space<vmem>>, %arg2: memref<8x4xf32, #tpu.memory_space<vmem>>, %arg3: memref<4x128xf32, #tpu.memory_space<vmem>>, %arg4: memref<1x128xf32, #tpu.memory_space<vmem>>, %arg5: memref<8x128xf32, #tpu.memory_space<vmem>>) attributes {dimension_semantics = [#tpu.dimension_semantics<parallel>], iteration_bounds = array<i64: 1>, scalar_prefetch = 0 : i64, scratch_operands = 0 : i64, tpu.core_type = #tpu.core_type<tc>, window_params = [{transform_indices = @transform_0, window_bounds = array<i64: 8, 128>}, {transform_indices = @transform_1, window_bounds = array<i64: 8, 4>}, {pipeline_mode = #tpu.pipeline_mode<synchronous>, transform_indices = @transform_2, window_bounds = array<i64: 4, 128>}, {pipeline_mode = #tpu.pipeline_mode<synchronous>, transform_indices = @transform_3, window_bounds = array<i64: 1, 128>}, {transform_indices = @transform_4, window_bounds = array<i64: 8, 128>}]} {
    %c0 = arith.constant 0 : index
    %c0_0 = arith.constant 0 : index
    %0 = vector.load %arg2[%c0, %c0_0] : memref<8x4xf32, #tpu.memory_space<vmem>>, vector<8x4xf32>
    %c0_1 = arith.constant 0 : index
    %c0_2 = arith.constant 0 : index
    %1 = vector.load %arg3[%c0_1, %c0_2] : memref<4x128xf32, #tpu.memory_space<vmem>>, vector<4x128xf32>
    %c0_3 = arith.constant 0 : index
    %c0_4 = arith.constant 0 : index
    %2 = vector.load %arg4[%c0_3, %c0_4] : memref<1x128xf32, #tpu.memory_space<vmem>>, vector<1x128xf32>
    %3 = vector.extract_strided_slice %0 {offsets = [0, 0], sizes = [8, 1], strides = [1, 1]} : vector<8x4xf32> to vector<8x1xf32>
    %4 = vector.extract_strided_slice %1 {offsets = [0, 0], sizes = [1, 128], strides = [1, 1]} : vector<4x128xf32> to vector<1x128xf32>
    %5 = vector.broadcast %3 : vector<8x1xf32> to vector<8x128xf32>
    %6 = vector.broadcast %4 : vector<1x128xf32> to vector<8x128xf32>
    %7 = arith.mulf %5, %6 : vector<8x128xf32>
    %8 = vector.broadcast %2 : vector<1x128xf32> to vector<8x128xf32>
    %9 = arith.addf %8, %7 : vector<8x128xf32>
    %10 = vector.extract_strided_slice %0 {offsets = [0, 1], sizes = [8, 1], strides = [1, 1]} : vector<8x4xf32> to vector<8x1xf32>
    %11 = vector.extract_strided_slice %1 {offsets = [1, 0], sizes = [1, 128], strides = [1, 1]} : vector<4x128xf32> to vector<1x128xf32>
    %12 = vector.broadcast %10 : vector<8x1xf32> to vector<8x128xf32>
    %13 = vector.broadcast %11 : vector<1x128xf32> to vector<8x128xf32>
    %14 = arith.mulf %12, %13 : vector<8x128xf32>
    %15 = arith.addf %9, %14 : vector<8x128xf32>
    %16 = vector.extract_strided_slice %0 {offsets = [0, 2], sizes = [8, 1], strides = [1, 1]} : vector<8x4xf32> to vector<8x1xf32>
    %17 = vector.extract_strided_slice %1 {offsets = [2, 0], sizes = [1, 128], strides = [1, 1]} : vector<4x128xf32> to vector<1x128xf32>
    %18 = vector.broadcast %16 : vector<8x1xf32> to vector<8x128xf32>
    %19 = vector.broadcast %17 : vector<1x128xf32> to vector<8x128xf32>
    %20 = arith.mulf %18, %19 : vector<8x128xf32>
    %21 = arith.addf %15, %20 : vector<8x128xf32>
    %22 = vector.extract_strided_slice %0 {offsets = [0, 3], sizes = [8, 1], strides = [1, 1]} : vector<8x4xf32> to vector<8x1xf32>
    %23 = vector.extract_strided_slice %1 {offsets = [3, 0], sizes = [1, 128], strides = [1, 1]} : vector<4x128xf32> to vector<1x128xf32>
    %24 = vector.broadcast %22 : vector<8x1xf32> to vector<8x128xf32>
    %25 = vector.broadcast %23 : vector<1x128xf32> to vector<8x128xf32>
    %26 = arith.mulf %24, %25 : vector<8x128xf32>
    %27 = arith.addf %21, %26 : vector<8x128xf32>
    %c0_5 = arith.constant 0 : index
    %c0_6 = arith.constant 0 : index
    %28 = vector.load %arg1[%c0_5, %c0_6] : memref<8x128xf32, #tpu.memory_space<vmem>>, vector<8x128xf32>
    %29 = arith.mulf %28, %27 : vector<8x128xf32>
    %c0_7 = arith.constant 0 : index
    %c0_8 = arith.constant 0 : index
    %30 = vector.load %arg5[%c0_7, %c0_8] : memref<8x128xf32, #tpu.memory_space<vmem>>, vector<8x128xf32>
    tpu.vector_store %arg5[%c0_7, %c0_8], %29 {strides = array<i32>} : memref<8x128xf32, #tpu.memory_space<vmem>>, vector<8x128xf32>,
    return
  }
  func.func @transform_0(%arg0: i32) -> (i32, i32) {
    %c0_i32 = arith.constant 0 : i32
    %c0_i32_0 = arith.constant 0 : i32
    return %arg0, %c0_i32 : i32, i32
  }
  func.func @transform_1(%arg0: i32) -> (i32, i32) {
    %c0_i32 = arith.constant 0 : i32
    %c0_i32_0 = arith.constant 0 : i32
    return %arg0, %c0_i32 : i32, i32
  }
  func.func @transform_2(%arg0: i32) -> (i32, i32) {
    %c0_i32 = arith.constant 0 : i32
    %c0_i32_0 = arith.constant 0 : i32
    %c0_i32_1 = arith.constant 0 : i32
    return %c0_i32, %c0_i32_0 : i32, i32
  }
  func.func @transform_3(%arg0: i32) -> (i32, i32) {
    %c0_i32 = arith.constant 0 : i32
    %c0_i32_0 = arith.constant 0 : i32
    %c0_i32_1 = arith.constant 0 : i32
    return %c0_i32, %c0_i32_0 : i32, i32
  }
  func.func @transform_4(%arg0: i32) -> (i32, i32) {
    %c0_i32 = arith.constant 0 : i32
    %c0_i32_0 = arith.constant 0 : i32
    return %arg0, %c0_i32 : i32, i32
  }
}

</mosaic_0001>

<bundles_post_ra>
// kernel: tpu_custom_call.1
= control target key start
LH: loop header
LB: loop body
LE: loop exit
PB: predicated region body
PF: predicated region fallthrough
CT: control target
= control target key end

     0   :  { %9 = vsyncpa [#allocation3], 0  ;;  %s289_s0 = inlined_call_operand.hbm [shape: f32[4,128], index: 0, kind: input, shape index: {}]   ;;  %s290_s1 = inlined_call_operand.hbm [shape: f32[4,4], index: 1, kind: input, shape index: {}]   ;;  %s291_s2 = inlined_call_operand.hbm [shape: f32[4,128], index: 2, kind: input, shape index: {}]   ;;  %s292_s3 = inlined_call_operand.vmem [shape: f32[1,128], index: 3, kind: input, shape index: {}]   ;;  %s293_s4 = inlined_call_operand.hbm [shape: f32[4,128], index: 4, kind: output, shape index: {}]  }
   0x1   :  { %10 = vsyncpa [#allocation6], 0 }
   0x2   :  { %11 = vsyncpa [#allocation4], 0 }
   0x3   :  { %16 = vsyncadd [#allocation3], 64  ;;  %s230_s15 = smov [#allocation2]  }
   0x4   :  { %s17_s16 = sshll.u32 %s230_s15, 4  ;;  %s18_s16 = int_to_ptr.vmem [resolvable:$true] %s17_s16 }
   0x5   :  { %s152_s17 = scalar_lea.vmem %s18_s16, 64  ;;  %s156_s18 = scalar_lea.vmem %s18_s16, 128 }
   0x6   :  { %p153_p0 = scmp.ne.s32.totalorder %s18_s16, %s152_s17  ;;  %p157_p1 = scmp.lt.s32.totalorder %s18_s16, %s18_s16 }
   0x7   :  { %p158_p2 = scmp.lt.s32.totalorder %s156_s18, %s152_s17 }
   0x9   :  { %p159_p3 = por %p158_p2, %p157_p1 }
   0xb   :  { %p160_p4 = pnand %p159_p3, %p153_p0 }
   0xd   :  { %163 = shalt.err (!%p160_p4)
}
   0xe   :  { %s231_s19 = smov 64   ;;  %s232_s20 = smov 4  }
   0xf   :  { %23 = dma.hbm_to_vmem [thread:$0]  %s289_s0, 64, %s18_s16, [#allocation3], %s231_s19, %s231_s19, %s232_s20  }
  0x10   :  { %28 = vsyncadd [#allocation6], 64  ;;  %s233_s23 = smov [#allocation5]   ;;  %s234_s25 = smov [#allocation7]  }
  0x11   :  { %s29_s24 = sshll.u32 %s233_s23, 4  ;;  %s42_s26 = sshll.u32 %s234_s25, 4  ;;  %s30_s24 = int_to_ptr.vmem [resolvable:$true] %s29_s24  ;;  %s43_s26 = int_to_ptr.vmem [resolvable:$true] %s42_s26 }
  0x12   :  { %s172_s27 = scalar_lea.vmem %s30_s24, 64  ;;  %s176_s28 = scalar_lea.vmem %s30_s24, 128 }
  0x13   :  { %p173_p5 = scmp.ne.s32.totalorder %s30_s24, %s172_s27  ;;  %p177_p6 = scmp.lt.s32.totalorder %s30_s24, %s30_s24 }
  0x14   :  { %p178_p7 = scmp.lt.s32.totalorder %s176_s28, %s172_s27 }
  0x16   :  { %p179_p8 = por %p178_p7, %p177_p6 }
  0x18   :  { %p180_p9 = pnand %p179_p8, %p173_p5 }
  0x1a   :  { %183 = shalt.err (!%p180_p9)
}
  0x1b   :  { %35 = dma.hbm_to_vmem [thread:$0]  %s290_s1, 64, %s30_s24, [#allocation6], %s231_s19, %s231_s19, %s232_s20  }
  0x1c   :  { %s192_s30 = scalar_lea.vmem %s43_s26, 64  ;;  %p197_p11 = scmp.lt.s32.totalorder %s43_s26, %s43_s26 }
  0x1d   :  { %p193_p10 = scmp.ne.s32.totalorder %s43_s26, %s192_s30  ;;  %p198_p12 = scmp.lt.s32.totalorder %s192_s30, %s192_s30 }
  0x1f   :  { %p199_p13 = por %p198_p12, %p197_p11 }
  0x21   :  { %p200_p0 = pnand %p199_p13, %p193_p10 }
  0x23   :  { %203 = shalt.err (!%p200_p0)
}
  0x24   :  { %45 = dma.hbm_to_vmem [thread:$0]  %s291_s2, 64, %s43_s26, [#allocation6]  }
  0x25   :  { %224 = dma.done.wait [#allocation3], 128  }
  0x26   :  { %225 = vsyncadd [#allocation3], 4294967168 }
  0x27   :  { %226 = dma.done.wait [#allocation6], 192  }
  0x28   :  { %227 = vsyncadd [#allocation6], 4294967104  ;;  %v235_v0 = vmov 0   ;;  %v236_v1 = vmov 2   ;;  %v57_v2 = vld [vmem:[#allocation5] sm:$0xff]  ;;  %v237_v3 = vmov 1   ;;  %v65_v5 = vlaneseq }
  0x29   :  { %139 = vset.pattern.permute.xlu0 %v235_v0  ;;  %141 = vset.pattern.permute.xlu1 %v236_v1  ;;  %v238_v4 = vmov 3   ;;  %v58_v8 = vld [vmem:[#allocation7] sm:$0xf]  ;;  %v128_v17 = vld [vmem:[%s292_s3] ss:$0 sm:$0xff] }
  0x2a   :  { %62 = vperm.xlu0 %139, %v57_v2   ;;  %88 = vperm.xlu1 %141, %v57_v2   ;;  %v66_v6 = vshrl.u32 %v65_v5, 7  ;;  %v107_v28 = vld [vmem:[#allocation2] sm:$0xff] }
  0x2c   :  { %v67_v7 = vsub.s32 0, %v66_v6  ;;  %v83_v10 = vsub.s32 1, %v66_v6  ;;  %v93_v12 = vsub.s32 2, %v66_v6  ;;  %v103_v14 = vsub.s32 3, %v66_v6 }
  0x2e   :  { %140 = vset.pattern.permute.xlu0 %v237_v3  ;;  %142 = vset.pattern.permute.xlu1 %v238_v4  ;;  %v68_v9 = vrot.slane %v58_v8, %v67_v7  ;;  %v84_v16 = vrot.slane %v58_v8, %v83_v10  ;;  %v94_v18 = vrot.slane %v58_v8, %v93_v12 }
  0x2f   :  { %78 = vperm.xlu0 %140, %v57_v2   ;;  %98 = vperm.xlu1 %142, %v57_v2   ;;  %v104_v19 = vrot.slane %v58_v8, %v103_v14 }
  0x33   :  { %143 = vset.pattern.permute.xlu0 %v238_v4 }
  0xa5   :  { %v63_v11 = vpop.permute.xlu0 %62  ;;  %v89_v13 = vpop.permute.xlu1 %88 }
  0xa6   :  { %v69_v15 = vmul.f32 %v68_v9, %v63_v11  ;;  %v95_v24 = vmul.f32 %v94_v18, %v89_v13 }
  0xa8   :  { %v76_v22 = vadd.f32 %v128_v17, %v69_v15 }
  0xaa   :  { %v79_v20 = vpop.permute.xlu0 %78  ;;  %v99_v21 = vpop.permute.xlu1 %98 }
  0xab   :  { %v85_v23 = vmul.f32 %v84_v16, %v79_v20  ;;  %v105_v26 = vmul.f32 %v104_v19, %v99_v21 }
  0xad   :  { %v86_v25 = vadd.f32 %v85_v23, %v76_v22 }
  0xaf   :  { %v96_v27 = vadd.f32 %v95_v24, %v86_v25 }
  0xb1   :  { %v106_v29 = vadd.f32 %v105_v26, %v96_v27 }
  0xb3   :  { %v108_v30 = vmul.f32 %v107_v28, %v106_v29 }
  0xb5   :  { %109 = vst [vmem:[#allocation8] sm:$0xff] %v108_v30 }
  0xb6   :  { %114 = vsyncadd [#allocation4], 64  ;;  %s239_s7 = smov [#allocation8]  }
  0xb7   :  { %s115_s8 = sshll.u32 %s239_s7, 4  ;;  %s116_s8 = int_to_ptr.vmem [resolvable:$true] %s115_s8 }
  0xb8   :  { %s204_s9 = scalar_lea.vmem %s116_s8, 64  ;;  %s208_s3 = scalar_lea.vmem %s116_s8, 128 }
  0xb9   :  { %p205_p1 = scmp.ne.s32.totalorder %s116_s8, %s204_s9  ;;  %p209_p2 = scmp.lt.s32.totalorder %s116_s8, %s116_s8 }
  0xba   :  { %p210_p3 = scmp.lt.s32.totalorder %s208_s3, %s204_s9 }
  0xbc   :  { %p211_p4 = por %p210_p3, %p209_p2 }
  0xbe   :  { %p212_p5 = pnand %p211_p4, %p205_p1 }
  0xc0   :  { %215 = shalt.err (!%p212_p5)
}
  0xc1   :  { %121 = dma.vmem_to_hbm [thread:$0]  %s116_s8, 64, %s293_s4, [#allocation4], %s231_s19, %s231_s19, %s232_s20  }
  0xc2   :  { %228 = dma.done.wait [#allocation4], 128  }
  0xc3   :  { %229 = vsyncadd [#allocation4], 4294967168 }
  0xc4   :  { %125 = vsyncpa [#allocation3], 1 }
  0xc5   :  { %126 = vsyncpa [#allocation6], 1 }
  0xc6   :  { %127 = vsyncpa [#allocation4], 1 }

</bundles_post_ra>
